<compile_context>
chip_gen: v7x
topology: tpu7x:2x2x1
jax: 0.10.0
libtpu: 0.0.40
codegen_flags: <defaults>
</compile_context>

<pallas_src>
import functools

import jax
import jax.numpy as jnp
from jax.experimental import pallas as pl
from jax.experimental.pallas import tpu as pltpu


def _modulation_kernel(x_ref, w_ref, b_ref, o_ref, xs_ref, *, tile_n):
    n = pl.program_id(0)

    # Hoisted SiLU: computed once (f32), cached in VMEM scratch for all tiles.
    @pl.when(n == 0)
    def _():
        x = x_ref[...].astype(jnp.float32)
        xs_ref[...] = (x * jax.nn.sigmoid(x)).astype(xs_ref.dtype)

    acc = jnp.dot(xs_ref[...], w_ref[...], preferred_element_type=jnp.float32)

    # Resident bias: slice the current TN window out of the full bias block.
    start = n * tile_n
    if tile_n % 128 == 0:
        start = pl.multiple_of(start, 128)
    acc = acc + b_ref[:, pl.ds(start, tile_n)].astype(jnp.float32)

    o_ref[...] = acc.astype(o_ref.dtype)


def _pick_tile_n(out_dim, in_dim, w_itemsize, w_buffer_budget_bytes):
    """Byte-budgeted, lane-dense (multiple-of-128) output tile width."""
    # Largest TN s.t. the double-buffered W slab (2 * in_dim * TN * bytes) fits.
    tn = (w_buffer_budget_bytes // (2 * in_dim * w_itemsize)) // 128 * 128
    tn = max(int(tn), 128)
    if out_dim <= tn:
        return out_dim                      # single full block (any width is legal)
    # Prefer an exact divisor of out_dim (no padded last tile) if it isn't much smaller.
    t = tn
    while t >= 128 and out_dim % t != 0:
        t -= 128
    if t >= 128 and t >= tn // 2:
        return t
    return tn                               # cdiv grid + masked last tile


def modulation_forward(x, w_t, b, *,
                       w_buffer_budget_bytes=24 << 20,
                       stream_weights_in_bf16=False):
    """x: (B, input_dim), w_t: (input_dim, out_dim), b: (out_dim,) -> (B, out_dim)."""
    B, in_dim = x.shape
    k_dim, out_dim = w_t.shape
    assert k_dim == in_dim, "weight must be pre-transposed to (input_dim, out_dim)"

    # Biggest bandwidth lever: stream W as bf16 (accumulation stays f32 on the MXU).
    if stream_weights_in_bf16 and w_t.dtype == jnp.float32:
        w_t = w_t.astype(jnp.bfloat16)

    w_itemsize = jnp.dtype(w_t.dtype).itemsize
    x_itemsize = jnp.dtype(x.dtype).itemsize
    b_itemsize = jnp.dtype(b.dtype).itemsize

    tn = _pick_tile_n(out_dim, in_dim, w_itemsize, w_buffer_budget_bytes)
    n_tiles = (out_dim + tn - 1) // tn
    padded_out = n_tiles * tn

    # Bias as a single resident (1, padded_N) block; zero-pad so the in-kernel
    # pl.ds slice of the last (possibly partial) tile never reads out of bounds.
    b2 = b.reshape(1, out_dim)
    if padded_out != out_dim:
        b2 = jnp.pad(b2, ((0, 0), (0, padded_out - out_dim)))

    # Advisory cost estimate: traffic is dominated by streaming W from HBM.
    cost = pl.CostEstimate(
        flops=2 * B * in_dim * out_dim,
        transcendentals=B * in_dim,                     # SiLU computed once
        bytes_accessed=(in_dim * out_dim * w_itemsize
                        + B * in_dim * x_itemsize
                        + padded_out * b_itemsize
                        + B * out_dim * x_itemsize),
    )

    # Scoped-VMEM budget: the double-buffered W slab dominates.  Clamp at 48 MiB,
    # leaving headroom inside v7x's 64 MiB physical VMEM (fine on 128 MiB v5e/v6e).
    tile_vmem = (2 * in_dim * tn * w_itemsize           # W double buffer
                 + 2 * B * tn * x_itemsize              # output double buffer
                 + padded_out * b_itemsize              # resident bias
                 + 2 * B * in_dim * x_itemsize          # resident x (+ headroom)
                 + B * in_dim * w_itemsize)             # SiLU scratch
    vmem_limit = int(min(max(tile_vmem + (4 << 20), 16 << 20), 48 << 20))

    kernel = functools.partial(_modulation_kernel, tile_n=tn)

    return pl.pallas_call(
        kernel,
        out_shape=jax.ShapeDtypeStruct((B, out_dim), x.dtype),
        grid=(n_tiles,),
        in_specs=[
            pl.BlockSpec((B, in_dim), lambda n: (0, 0)),       # x: resident
            pl.BlockSpec((in_dim, tn), lambda n: (0, n)),      # W: streamed over N
            pl.BlockSpec((1, padded_out), lambda n: (0, 0)),   # bias: resident
        ],
        out_specs=pl.BlockSpec((B, tn), lambda n: (0, n)),
        scratch_shapes=[pltpu.VMEM((B, in_dim), w_t.dtype)],   # cached SiLU(x)
        compiler_params=pltpu.CompilerParams(
            # "arbitrary": the SiLU scratch is written at program_id 0 and reused
            # by later steps, so the N axis must run sequentially on one core.
            # TODO(synk): for explicit v7x 2-TC sharding, split N across cores via
            # pl.core_map / CORE_PARALLEL with a per-core SiLU init.
            dimension_semantics=("arbitrary",),
            vmem_limit_bytes=vmem_limit,
        ),
        cost_estimate=cost,
    )(x, w_t, b2)


if __name__ == "__main__":
    # Small shapes consistent with the module.
    batch = 2
    input_dim = 32
    hidden_size = 32
    n_mods = 4
    out_dim = n_mods * hidden_size  # 128

    key = jax.random.PRNGKey(0)
    kx, kw, kb = jax.random.split(key, 3)

    # Deterministic init mimicking nn.Linear default (uniform +/- 1/sqrt(in)).
    bound = 1.0 / (input_dim ** 0.5)
    # PyTorch Linear stores weight as (out, in); we keep the transposed (in, out) layout.
    w_t = jax.random.uniform(kw, (input_dim, out_dim), jnp.float32, -bound, bound)
    b = jax.random.uniform(kb, (out_dim,), jnp.float32, -bound, bound)
    x = jax.random.normal(kx, (batch, input_dim), jnp.float32)

    # Exact-precision path (matches the PyTorch module's f32 numerics).
    y = modulation_forward(x, w_t, b)
    jax.block_until_ready(y)

    y_ref = jax.nn.silu(x) @ w_t + b
    assert y.shape == (batch, out_dim)
    assert jnp.allclose(y, y_ref, atol=1e-5, rtol=1e-5)

    # bf16 weight-streaming path (the main bandwidth optimization); only weight/
    # activation rounding differs, so compare against the f32 reference loosely.
    y_bf16 = modulation_forward(x, w_t, b, stream_weights_in_bf16=True)
    jax.block_until_ready(y_bf16)
    assert jnp.allclose(y_bf16, y_ref, atol=5e-2, rtol=5e-2)

    print("KERNEL_OK")
</pallas_src>

<mosaic_0001>
module attributes {stable_mosaic.version = 11 : i64} {
  func.func @_modulation_kernel(%arg0: i32, %arg1: memref<2x32xf32, #tpu.memory_space<vmem>>, %arg2: memref<32x128xf32, #tpu.memory_space<vmem>>, %arg3: memref<1x128xf32, #tpu.memory_space<vmem>>, %arg4: memref<2x128xf32, #tpu.memory_space<vmem>>, %arg5: memref<2x32xf32, #tpu.memory_space<vmem>>) attributes {dimension_semantics = [#tpu.dimension_semantics<arbitrary>], iteration_bounds = array<i64: 1>, scalar_prefetch = 0 : i64, scratch_operands = 1 : i64, tpu.core_type = #tpu.core_type<tc>, window_params = [{pipeline_mode = #tpu.pipeline_mode<synchronous>, transform_indices = @transform_0, window_bounds = array<i64: 2, 32>}, {transform_indices = @transform_1, window_bounds = array<i64: 32, 128>}, {pipeline_mode = #tpu.pipeline_mode<synchronous>, transform_indices = @transform_2, window_bounds = array<i64: 1, 128>}, {transform_indices = @transform_3, window_bounds = array<i64: 2, 128>}]} {
    %c0_i32 = arith.constant 0 : i32
    %0 = arith.cmpi eq, %arg0, %c0_i32 : i32
    %1 = arith.extui %0 : i1 to i32
    %c0_i32_0 = arith.constant 0 : i32
    %2 = arith.cmpi ne, %1, %c0_i32_0 : i32
    scf.if %2 {
      %c0_7 = arith.constant 0 : index
      %c0_8 = arith.constant 0 : index
      %13 = vector.load %arg1[%c0_7, %c0_8] : memref<2x32xf32, #tpu.memory_space<vmem>>, vector<2x32xf32>
      %14 = arith.negf %13 : vector<2x32xf32>
      %15 = math.exp %14 : vector<2x32xf32>
      %cst_9 = arith.constant 1.000000e+00 : f32
      %16 = vector.broadcast %cst_9 : f32 to vector<2x32xf32>
      %17 = arith.addf %16, %15 : vector<2x32xf32>
      %18 = arith.divf %16, %17 : vector<2x32xf32>
      %19 = arith.mulf %13, %18 : vector<2x32xf32>
      %c0_10 = arith.constant 0 : index
      %c0_11 = arith.constant 0 : index
      %20 = vector.load %arg5[%c0_10, %c0_11] : memref<2x32xf32, #tpu.memory_space<vmem>>, vector<2x32xf32>
      tpu.vector_store %arg5[%c0_10, %c0_11], %19 {strides = array<i32>} : memref<2x32xf32, #tpu.memory_space<vmem>>, vector<2x32xf32>,
    } else {
    }
    %c0 = arith.constant 0 : index
    %c0_1 = arith.constant 0 : index
    %3 = vector.load %arg5[%c0, %c0_1] : memref<2x32xf32, #tpu.memory_space<vmem>>, vector<2x32xf32>
    %c0_2 = arith.constant 0 : index
    %c0_3 = arith.constant 0 : index
    %4 = vector.load %arg2[%c0_2, %c0_3] : memref<32x128xf32, #tpu.memory_space<vmem>>, vector<32x128xf32>
    %cst = arith.constant dense<0.000000e+00> : vector<2x128xf32>
    %5 = tpu.matmul %3, %4, %cst {dimension_numbers = #tpu.dot_dimension_numbers<[1], [0], [0], [1], [0, 0, 1, 1], [], []>} : vector<2x32xf32>, vector<32x128xf32>, vector<2x128xf32> -> vector<2x128xf32>
    %c128_i32 = arith.constant 128 : i32
    %6 = arith.muli %arg0, %c128_i32 : i32
    %7 = tpu.assume_multiple %6, 128 : i32
    %c0_4 = arith.constant 0 : index
    %8 = arith.index_cast %7 : i32 to index
    %9 = vector.load %arg3[%c0_4, %8] : memref<1x128xf32, #tpu.memory_space<vmem>>, vector<1x128xf32>
    %10 = vector.broadcast %9 : vector<1x128xf32> to vector<2x128xf32>
    %11 = arith.addf %5, %10 : vector<2x128xf32>
    %c0_5 = arith.constant 0 : index
    %c0_6 = arith.constant 0 : index
    %12 = vector.load %arg4[%c0_5, %c0_6] : memref<2x128xf32, #tpu.memory_space<vmem>>, vector<2x128xf32>
    tpu.vector_store %arg4[%c0_5, %c0_6], %11 {strides = array<i32>} : memref<2x128xf32, #tpu.memory_space<vmem>>, vector<2x128xf32>,
    return
  }
  func.func @transform_0(%arg0: i32) -> (i32, i32) {
    %c0_i32 = arith.constant 0 : i32
    %c0_i32_0 = arith.constant 0 : i32
    %c0_i32_1 = arith.constant 0 : i32
    return %c0_i32, %c0_i32_0 : i32, i32
  }
  func.func @transform_1(%arg0: i32) -> (i32, i32) {
    %c0_i32 = arith.constant 0 : i32
    %c0_i32_0 = arith.constant 0 : i32
    return %c0_i32, %arg0 : i32, i32
  }
  func.func @transform_2(%arg0: i32) -> (i32, i32) {
    %c0_i32 = arith.constant 0 : i32
    %c0_i32_0 = arith.constant 0 : i32
    %c0_i32_1 = arith.constant 0 : i32
    return %c0_i32, %c0_i32_0 : i32, i32
  }
  func.func @transform_3(%arg0: i32) -> (i32, i32) {
    %c0_i32 = arith.constant 0 : i32
    %c0_i32_0 = arith.constant 0 : i32
    return %c0_i32, %arg0 : i32, i32
  }
}

</mosaic_0001>

<bundles_post_ra>
// kernel: tpu_custom_call.1
= control target key start
LH: loop header
LB: loop body
LE: loop exit
PB: predicated region body
PF: predicated region fallthrough
CT: control target
= control target key end

     0   :  { %8 = vsyncpa [#allocation4], 0  ;;  %s346_s0 = inlined_call_operand.hbm [shape: f32[2,32], index: 0, kind: input, shape index: {}]   ;;  %s347_s1 = inlined_call_operand.hbm [shape: f32[32,128], index: 1, kind: input, shape index: {}]   ;;  %s348_s2 = inlined_call_operand.vmem [shape: f32[1,128], index: 2, kind: input, shape index: {}]   ;;  %s349_s3 = inlined_call_operand.hbm [shape: f32[2,128], index: 3, kind: output, shape index: {}]  }
   0x1   :  { %9 = vsyncpa [#allocation7], 0 }
   0x2   :  { %10 = vsyncpa [#allocation5], 0  ;;  %s272_s12 = smov [#allocation3]   ;;  %s273_s14 = smov [#allocation6]  }
   0x3   :  { %s17_s13 = sshll.u32 %s272_s12, 4  ;;  %s26_s15 = sshll.u32 %s273_s14, 4  ;;  %s18_s13 = int_to_ptr.vmem [resolvable:$true] %s17_s13  ;;  %s300_s15 = int_to_ptr.vmem [resolvable:$true] %s26_s15 }
   0x4   :  { %s200_s18 = scalar_lea.hbm %s346_s0, 32 }
   0x5   :  { %p201_p0 = scmp.ne.s32.totalorder %s346_s0, %s200_s18  ;;  %p204_p1 = scmp.lt.u32.totalorder %s200_s18, %s346_s0 }
   0x7   :  { %p206_p2 = pnand %p204_p1, %p201_p0 }
   0x9   :  { %209 = shalt.err (!%p206_p2)
}
   0xa   :  { %s210_s23 = scalar_lea.vmem %s18_s13, 32  ;;  %p215_p4 = scmp.lt.s32.totalorder %s18_s13, %s18_s13 }
   0xb   :  { %p211_p3 = scmp.ne.s32.totalorder %s18_s13, %s210_s23  ;;  %p216_p5 = scmp.lt.s32.totalorder %s210_s23, %s210_s23 }
   0xd   :  { %p217_p6 = por %p216_p5, %p215_p4 }
   0xf   :  { %p218_p7 = pnand %p217_p6, %p211_p3 }
  0x11   :  { %221 = shalt.err (!%p218_p7)
}
  0x12   :  { %20 = dma.hbm_to_vmem [thread:$0]  %s346_s0, 32, %s18_s13, [#allocation4]  }
  0x13   :  { %s222_s28 = scalar_lea.hbm %s347_s1, 512 }
  0x14   :  { %p223_p8 = scmp.ne.s32.totalorder %s347_s1, %s222_s28  ;;  %p226_p9 = scmp.lt.u32.totalorder %s222_s28, %s347_s1 }
  0x16   :  { %p228_p10 = pnand %p226_p9, %p223_p8 }
  0x18   :  { %231 = shalt.err (!%p228_p10)
}
  0x19   :  { %s232_s6 = scalar_lea.vmem %s300_s15, 512  ;;  %p237_p12 = scmp.lt.s32.totalorder %s300_s15, %s300_s15 }
  0x1a   :  { %p233_p11 = scmp.ne.s32.totalorder %s300_s15, %s232_s6  ;;  %p238_p13 = scmp.lt.s32.totalorder %s232_s6, %s232_s6 }
  0x1c   :  { %p239_p0 = por %p238_p13, %p237_p12 }
  0x1e   :  { %p240_p1 = pnand %p239_p0, %p233_p11 }
  0x20   :  { %243 = shalt.err (!%p240_p1)
}
  0x21   :  { %s274_s0 = smov 128   ;;  %s275_s7 = smov 8  }
  0x22   :  { %32 = dma.hbm_to_vmem [thread:$0]  %s347_s1, 512, %s300_s15, [#allocation7], %s274_s0, %s274_s0, %s275_s7  }
  0x23   :  { %266 = dma.done.wait [#allocation4], 32  }
  0x24   :  { %267 = vsyncadd [#allocation4], 4294967264 }
  0x25   :  { %268 = dma.done.wait [#allocation7], 512  }
  0x26   :  { %269 = vsyncadd [#allocation7], 4294966784  ;;  %v276_v0 = vmov 0.0|0.0   ;;  %vm277_vm0 = vmmov 0   ;;  %v278_v1 = vmov 0.0   ;;  %v56_v3 = vld [vmem:[#allocation6] sm:$0xff] }
  0x27   :  { %182 = vmatprep.subr.bf16.mxu0 %v276_v0  ;;  %179 = vmatprep.mubr.msk.f32.mxu0 %vm277_vm0, %v278_v1  ;;  %v45_v2 = vld [vmem:[#allocation3] sm:$0x3]  ;;  %v57_v4 = vld [vmem:[#allocation6 + $0x8] sm:$0xff]  ;;  %v58_v7 = vld [vmem:[#allocation6 + $0x10] sm:$0xff]  ;;  %vm53_vm1 = vcmask 254976   ;;  %vm71_vm2 = vcmask 261120  }
  0x28   :  { %v163_v5 = vmul.f32 -1.442695, %v45_v2  ;;  %v183_v6 = vpack.c.bf16 %v57_v4, %v56_v3  ;;  %v59_v8 = vld [vmem:[#allocation6 + $0x18] sm:$0xff]  ;;  %s279_s11 = smov [#allocation8]  }
  0x29   :  { %v186_v9 = vpack.c.bf16 %v59_v8, %v58_v7  ;;  %v164_v15 = vld [vmem:[%s348_s2] ss:$0 sm:$0xff]  ;;  %s152_s12 = sshll.u32 %s279_s11, 4  ;;  %s153_s12 = int_to_ptr.vmem [resolvable:$true] %s152_s12 }
  0x2a   :  { %196 = vpow2.f32 %v163_v5  ;;  %184 = vmatpush3.bf16.msra.mxu0 %v183_v6  ;;  %s244_s13 = scalar_lea.vmem %s153_s12, 32  ;;  %p249_p3 = scmp.lt.s32.totalorder %s153_s12, %s153_s12 }
  0x2b   :  { %185 = vmatprep.subr.bf16.mxu0 %v276_v0  ;;  %p245_p2 = scmp.ne.s32.totalorder %s153_s12, %s244_s13  ;;  %p250_p4 = scmp.lt.s32.totalorder %s244_s13, %s244_s13 }
  0x2d   :  { %p251_p5 = por %p250_p4, %p249_p3 }
  0x2e   :  { %187 = vmatpush3.bf16.msra.mxu0 %v186_v9 }
  0x2f   :  { %p252_p6 = pnand %p251_p5, %p245_p2 }
  0x34   :  { %v197_v10 = vpop.eup %196 }
  0x35   :  { %v49_v11 = vadd.f32 1.0, %v197_v10 }
  0x37   :  { %198 = vrcp.f32 %v49_v11 }
  0x41   :  { %v199_v12 = vpop.eup %198 }
  0x42   :  { %v52_v13 = vmul.f32 %v199_v12, %v45_v2 }
  0x44   :  { %54 = vst.msk [vmem:[#allocation2] sm:$0x3] %vm53_vm1, %v52_v13 }
  0x4b   :  { %v55_v14 = vld [vmem:[#allocation2] sm:$0x3] }
  0x4c   :  { %180 = vmatmul.mubr.msk.f32.vlgmr.msra.gmra.mrb[0].mxu0 %vm71_vm2, %v55_v14 }
 0x11f   :  { %v141_v16 = vpop.f32.mrb[0].mxu0 }
 0x120   :  { %v142_v17 = vadd.f32 %v164_v15, %v141_v16  ;;  %v181_v18 = vpop.f32.mrb[1].mxu0 }
 0x122   :  { %145 = vst [vmem:[#allocation8] sm:$0x3] %v142_v17 }
 0x123   :  { %255 = shalt.err (!%p252_p6)
}
 0x124   :  { %s256_s16 = scalar_lea.hbm %s349_s3, 32 }
 0x125   :  { %p257_p7 = scmp.ne.s32.totalorder %s349_s3, %s256_s16  ;;  %p260_p8 = scmp.lt.u32.totalorder %s256_s16, %s349_s3 }
 0x127   :  { %p262_p9 = pnand %p260_p8, %p257_p7 }
 0x129   :  { %265 = shalt.err (!%p262_p9)
}
 0x12a   :  { %155 = dma.vmem_to_hbm [thread:$0]  %s153_s12, 32, %s349_s3, [#allocation5]  }
 0x12b   :  { %270 = dma.done.wait [#allocation5], 32  }
 0x12c   :  { %271 = vsyncadd [#allocation5], 4294967264 }
 0x12d   :  { %159 = vsyncpa [#allocation4], 1 }
 0x12e   :  { %160 = vsyncpa [#allocation7], 1 }
 0x12f   :  { %161 = vsyncpa [#allocation5], 1 }

</bundles_post_ra>
